<compile_context>
chip_gen: v6e
topology: v6e:2x2x1
jax: 0.10.0
libtpu: 0.0.40
codegen_flags: <defaults>
</compile_context>

<pallas_src>
import jax
import jax.numpy as jnp
from jax import lax
from jax.experimental import pallas as pl
from jax.experimental.pallas import tpu as pltpu


def _round_up(n: int, m: int) -> int:
    return ((n + m - 1) // m) * m


def _make_kernel(tb, b_real, b_pad, h_pad, a_pad, eps):
    inv_b = 1.0 / float(b_real)
    needs_row_mask = (b_pad != b_real)   # zero-padded batch rows present?

    def kernel(x_ref, w1_ref, w2_ref, w3_ref, vec_ref, o_ref,
               sum1_ref, sumsq1_ref, sum2_ref, sumsq2_ref):
        phase = pl.program_id(0)
        tile = pl.program_id(1)

        @pl.when(jnp.logical_and(phase == 0, tile == 0))
        def _init_stats():
            z = jnp.zeros((1, h_pad), jnp.float32)
            sum1_ref[...] = z
            sumsq1_ref[...] = z
            sum2_ref[...] = z
            sumsq2_ref[...] = z

        # fc1 (bias-free: the bias cancels against BN's mean subtraction).
        # bf16 operands, f32 accumulation on the MXU.  Zero-padded batch rows
        # of x give exactly-zero h1 rows, so they contribute 0 to the stats.
        h1 = jnp.dot(x_ref[...], w1_ref[...], preferred_element_type=jnp.float32)

        def bn_relu(h, s_ref, ss_ref, gamma, beta):
            # single-pass stats + fused scale/shift (all f32)
            mean = s_ref[...] * inv_b
            var = ss_ref[...] * inv_b - mean * mean
            scale = gamma * lax.rsqrt(var + eps)        # EUP slot
            shift = beta - mean * scale
            return jnp.maximum(h * scale + shift, 0.0)

        def mask_pad_rows(a):
            if not needs_row_mask:
                return a
            row = tile * tb + lax.broadcasted_iota(jnp.int32, (tb, h_pad), 0)
            return jnp.where(row < b_real, a, 0.0)

        def act1_to_h2():
            a1 = mask_pad_rows(
                bn_relu(h1, sum1_ref, sumsq1_ref,
                        vec_ref[0:1, :h_pad], vec_ref[1:2, :h_pad]))
            return jnp.dot(a1.astype(jnp.bfloat16), w2_ref[...],
                           preferred_element_type=jnp.float32)

        @pl.when(phase == 0)
        def _phase0():   # accumulate global batch stats of h1
            sum1_ref[...] += jnp.sum(h1, axis=0, keepdims=True)
            sumsq1_ref[...] += jnp.sum(h1 * h1, axis=0, keepdims=True)

        @pl.when(phase == 1)
        def _phase1():   # accumulate global batch stats of h2
            h2 = act1_to_h2()
            sum2_ref[...] += jnp.sum(h2, axis=0, keepdims=True)
            sumsq2_ref[...] += jnp.sum(h2 * h2, axis=0, keepdims=True)

        @pl.when(phase == 2)
        def _phase2():   # normalize, fc3, lane-dense store
            h2 = act1_to_h2()
            a2 = bn_relu(h2, sum2_ref, sumsq2_ref,
                         vec_ref[2:3, :h_pad], vec_ref[3:4, :h_pad])
            q = jnp.dot(a2.astype(jnp.bfloat16), w3_ref[...],
                        preferred_element_type=jnp.float32)
            q = q + vec_ref[4:5, :a_pad]                 # fc3 bias
            o_ref[...] = q.astype(o_ref.dtype)

    return kernel


def qnetwork_forward(x, params, *, batch_tile=512, eps=1e-5):
    """Fused QNetwork forward pass. x: (B, state_size) f32 -> (B, action_size) f32.

    batch_tile: rows per grid step. Keep 2*batch_tile*(S_pad+2*H_pad)*4 bytes plus
    the (bf16) weights under the scoped VMEM limit (v7x has only 64 MiB per TC).
    """
    w1, b1, g1, be1, w2, b2, g2, be2, w3, b3 = params
    # b1/b2 accepted for API fidelity but unused: a pre-BN bias is cancelled
    # exactly by training-mode BatchNorm's mean subtraction.
    del b1, b2

    B, S = x.shape
    H = w1.shape[1]
    A = w3.shape[1]

    S_pad = _round_up(S, 128)
    H_pad = _round_up(H, 128)
    A_pad = _round_up(A, 128)
    VEC_W = max(H_pad, A_pad)

    tb = min(_round_up(batch_tile, 8), _round_up(B, 8))
    B_pad = _round_up(B, tb)
    n_tiles = B_pad // tb

    f32, bf16 = jnp.float32, jnp.bfloat16
    xp = jnp.pad(x.astype(f32), ((0, B_pad - B), (0, S_pad - S))).astype(bf16)
    w1p = jnp.pad(w1, ((0, S_pad - S), (0, H_pad - H))).astype(bf16)
    w2p = jnp.pad(w2, ((0, H_pad - H), (0, H_pad - H))).astype(bf16)
    w3p = jnp.pad(w3, ((0, H_pad - H), (0, A_pad - A))).astype(bf16)

    def _row(v, width):
        v = jnp.asarray(v, f32).reshape(1, -1)
        return jnp.pad(v, ((0, 0), (0, width - v.shape[1])))

    # gamma1, beta1, gamma2, beta2, b3 stacked into one lane-padded (8, W) array.
    # Padded feature columns get gamma=beta=0 so they stay exactly zero through BN.
    vec = jnp.concatenate(
        [_row(g1, VEC_W), _row(be1, VEC_W), _row(g2, VEC_W), _row(be2, VEC_W),
         _row(b3, VEC_W), jnp.zeros((3, VEC_W), f32)], axis=0)

    grid_spec = pltpu.PrefetchScalarGridSpec(
        num_scalar_prefetch=0,
        grid=(3, n_tiles),       # (phase, batch tile) — both carry scratch state
        in_specs=[
            pl.BlockSpec((tb, S_pad), lambda p, i: (i, 0)),
            pl.BlockSpec((S_pad, H_pad), lambda p, i: (0, 0)),   # VMEM-resident
            pl.BlockSpec((H_pad, H_pad), lambda p, i: (0, 0)),
            pl.BlockSpec((H_pad, A_pad), lambda p, i: (0, 0)),
            pl.BlockSpec((8, VEC_W), lambda p, i: (0, 0)),
        ],
        out_specs=pl.BlockSpec((tb, A_pad), lambda p, i: (i, 0)),
        scratch_shapes=[pltpu.VMEM((1, H_pad), jnp.float32)] * 4,
    )

    out = pl.pallas_call(
        _make_kernel(tb, B, B_pad, H_pad, A_pad, eps),
        out_shape=jax.ShapeDtypeStruct((B_pad, A_pad), f32),
        grid_spec=grid_spec,
        compiler_params=pltpu.CompilerParams(
            # Both axes are reductions over the shared BN-stat scratch -> "arbitrary".
            # TODO(synk): on v7x the 2nd TensorCore is only usable via a
            # BN-independent outer axis (e.g. an ensemble of Q-nets).
            dimension_semantics=("arbitrary", "arbitrary")),
    )(xp, w1p, w2p, w3p, vec)

    return out[:B, :A]


def init_params(key, state_size, action_size, hidden_size):
    """nn.Linear-style init (uniform +/- 1/sqrt(fan_in)), BatchNorm1d defaults.
    Weights stored transposed vs PyTorch: (in, out)."""
    ks = jax.random.split(key, 6)

    def linear(kw, kb, fan_in, fan_out):
        bound = 1.0 / jnp.sqrt(jnp.float32(fan_in))
        w = jax.random.uniform(kw, (fan_in, fan_out), jnp.float32, -bound, bound)
        b = jax.random.uniform(kb, (1, fan_out), jnp.float32, -bound, bound)
        return w, b

    w1, b1 = linear(ks[0], ks[1], state_size, hidden_size)
    w2, b2 = linear(ks[2], ks[3], hidden_size, hidden_size)
    w3, b3 = linear(ks[4], ks[5], hidden_size, action_size)
    g1 = jnp.ones((1, hidden_size), jnp.float32)
    be1 = jnp.zeros((1, hidden_size), jnp.float32)
    g2 = jnp.ones((1, hidden_size), jnp.float32)
    be2 = jnp.zeros((1, hidden_size), jnp.float32)
    return (w1, b1, g1, be1, w2, b2, g2, be2, w3, b3)


def reference_forward(x, params, eps=1e-5):
    """Pure-JAX f32 reference matching the PyTorch module (training-mode BN)."""
    w1, b1, g1, be1, w2, b2, g2, be2, w3, b3 = params

    def bn_relu(h, g, b):
        m = jnp.mean(h, axis=0, keepdims=True)
        v = jnp.mean((h - m) ** 2, axis=0, keepdims=True)
        return jnp.maximum((h - m) * lax.rsqrt(v + eps) * g + b, 0.0)

    h1 = bn_relu(x @ w1 + b1, g1, be1)
    h2 = bn_relu(h1 @ w2 + b2, g2, be2)
    return h2 @ w3 + b3


if __name__ == "__main__":
    batch = 32
    state_size = 16
    action_size = 4
    hidden_size = 128   # module default

    key = jax.random.PRNGKey(0)
    k_x, k_p = jax.random.split(key)
    x = jax.random.normal(k_x, (batch, state_size), jnp.float32)
    params = init_params(k_p, state_size, action_size, hidden_size)

    # batch_tile=16 -> 2 batch tiles, exercising the cross-tile (global) BN stats.
    q_values = qnetwork_forward(x, params, batch_tile=16)
    jax.block_until_ready(q_values)

    assert q_values.shape == (batch, action_size)
    assert q_values.dtype == jnp.float32
    assert bool(jnp.all(jnp.isfinite(q_values)))

    q_ref = reference_forward(x, params)
    max_err = float(jnp.max(jnp.abs(q_values - q_ref)))
    assert max_err < 7.5e-2, f"max abs error vs f32 reference: {max_err}"

    print("KERNEL_OK")
</pallas_src>

<mosaic_0001>
module attributes {stable_mosaic.version = 11 : i64} {
  func.func @kernel(%arg0: i32, %arg1: i32, %arg2: memref<16x128xbf16, #tpu.memory_space<vmem>>, %arg3: memref<128x128xbf16, #tpu.memory_space<vmem>>, %arg4: memref<128x128xbf16, #tpu.memory_space<vmem>>, %arg5: memref<128x128xbf16, #tpu.memory_space<vmem>>, %arg6: memref<8x128xf32, #tpu.memory_space<vmem>>, %arg7: memref<16x128xf32, #tpu.memory_space<vmem>>, %arg8: memref<1x128xf32, #tpu.memory_space<vmem>>, %arg9: memref<1x128xf32, #tpu.memory_space<vmem>>, %arg10: memref<1x128xf32, #tpu.memory_space<vmem>>, %arg11: memref<1x128xf32, #tpu.memory_space<vmem>>) attributes {dimension_semantics = [#tpu.dimension_semantics<arbitrary>, #tpu.dimension_semantics<arbitrary>], iteration_bounds = array<i64: 3, 2>, scalar_prefetch = 0 : i64, scratch_operands = 4 : i64, tpu.core_type = #tpu.core_type<tc>, window_params = [{transform_indices = @transform_0, window_bounds = array<i64: 16, 128>}, {pipeline_mode = #tpu.pipeline_mode<synchronous>, transform_indices = @transform_1, window_bounds = array<i64: 128, 128>}, {pipeline_mode = #tpu.pipeline_mode<synchronous>, transform_indices = @transform_2, window_bounds = array<i64: 128, 128>}, {pipeline_mode = #tpu.pipeline_mode<synchronous>, transform_indices = @transform_3, window_bounds = array<i64: 128, 128>}, {pipeline_mode = #tpu.pipeline_mode<synchronous>, transform_indices = @transform_4, window_bounds = array<i64: 8, 128>}, {transform_indices = @transform_5, window_bounds = array<i64: 16, 128>}]} {
    %c0_i32 = arith.constant 0 : i32
    %0 = arith.cmpi eq, %arg0, %c0_i32 : i32
    %c0_i32_0 = arith.constant 0 : i32
    %1 = arith.cmpi eq, %arg1, %c0_i32_0 : i32
    %2 = arith.andi %0, %1 : i1
    %3 = arith.extui %2 : i1 to i32
    %c0_i32_1 = arith.constant 0 : i32
    %4 = arith.cmpi ne, %3, %c0_i32_1 : i32
    scf.if %4 {
      %cst_9 = arith.constant 0.000000e+00 : f32
      %17 = vector.broadcast %cst_9 : f32 to vector<1x128xf32>
      %c0_10 = arith.constant 0 : index
      %c0_11 = arith.constant 0 : index
      %18 = vector.load %arg8[%c0_10, %c0_11] : memref<1x128xf32, #tpu.memory_space<vmem>>, vector<1x128xf32>
      tpu.vector_store %arg8[%c0_10, %c0_11], %17 {strides = array<i32>} : memref<1x128xf32, #tpu.memory_space<vmem>>, vector<1x128xf32>,
      %c0_12 = arith.constant 0 : index
      %c0_13 = arith.constant 0 : index
      %19 = vector.load %arg9[%c0_12, %c0_13] : memref<1x128xf32, #tpu.memory_space<vmem>>, vector<1x128xf32>
      tpu.vector_store %arg9[%c0_12, %c0_13], %17 {strides = array<i32>} : memref<1x128xf32, #tpu.memory_space<vmem>>, vector<1x128xf32>,
      %c0_14 = arith.constant 0 : index
      %c0_15 = arith.constant 0 : index
      %20 = vector.load %arg10[%c0_14, %c0_15] : memref<1x128xf32, #tpu.memory_space<vmem>>, vector<1x128xf32>
      tpu.vector_store %arg10[%c0_14, %c0_15], %17 {strides = array<i32>} : memref<1x128xf32, #tpu.memory_space<vmem>>, vector<1x128xf32>,
      %c0_16 = arith.constant 0 : index
      %c0_17 = arith.constant 0 : index
      %21 = vector.load %arg11[%c0_16, %c0_17] : memref<1x128xf32, #tpu.memory_space<vmem>>, vector<1x128xf32>
      tpu.vector_store %arg11[%c0_16, %c0_17], %17 {strides = array<i32>} : memref<1x128xf32, #tpu.memory_space<vmem>>, vector<1x128xf32>,
    } else {
    }
    %c0 = arith.constant 0 : index
    %c0_2 = arith.constant 0 : index
    %5 = vector.load %arg2[%c0, %c0_2] : memref<16x128xbf16, #tpu.memory_space<vmem>>, vector<16x128xbf16>
    %c0_3 = arith.constant 0 : index
    %c0_4 = arith.constant 0 : index
    %6 = vector.load %arg3[%c0_3, %c0_4] : memref<128x128xbf16, #tpu.memory_space<vmem>>, vector<128x128xbf16>
    %cst = arith.constant dense<0.000000e+00> : vector<16x128xf32>
    %7 = tpu.matmul %5, %6, %cst {dimension_numbers = #tpu.dot_dimension_numbers<[1], [0], [0], [1], [0, 0, 1, 1], [], []>} : vector<16x128xbf16>, vector<128x128xbf16>, vector<16x128xf32> -> vector<16x128xf32>
    %c0_i32_5 = arith.constant 0 : i32
    %8 = arith.cmpi eq, %arg0, %c0_i32_5 : i32
    %9 = arith.extui %8 : i1 to i32
    %c0_i32_6 = arith.constant 0 : i32
    %10 = arith.cmpi ne, %9, %c0_i32_6 : i32
    scf.if %10 {
      %c0_9 = arith.constant 0 : index
      %c0_10 = arith.constant 0 : index
      %17 = vector.load %arg8[%c0_9, %c0_10] : memref<1x128xf32, #tpu.memory_space<vmem>>, vector<1x128xf32>
      %cst_11 = arith.constant dense<0.000000e+00> : vector<128xf32>
      %18 = vector.multi_reduction <add>, %7, %cst_11 [0] : vector<16x128xf32> to vector<128xf32>
      %19 = vector.shape_cast %18 : vector<128xf32> to vector<1x128xf32>
      %20 = arith.addf %17, %19 : vector<1x128xf32>
      %c0_12 = arith.constant 0 : index
      %c0_13 = arith.constant 0 : index
      %21 = vector.load %arg8[%c0_12, %c0_13] : memref<1x128xf32, #tpu.memory_space<vmem>>, vector<1x128xf32>
      tpu.vector_store %arg8[%c0_12, %c0_13], %20 {strides = array<i32>} : memref<1x128xf32, #tpu.memory_space<vmem>>, vector<1x128xf32>,
      %c0_14 = arith.constant 0 : index
      %c0_15 = arith.constant 0 : index
      %22 = vector.load %arg9[%c0_14, %c0_15] : memref<1x128xf32, #tpu.memory_space<vmem>>, vector<1x128xf32>
      %23 = arith.mulf %7, %7 : vector<16x128xf32>
      %cst_16 = arith.constant dense<0.000000e+00> : vector<128xf32>
      %24 = vector.multi_reduction <add>, %23, %cst_16 [0] : vector<16x128xf32> to vector<128xf32>
      %25 = vector.shape_cast %24 : vector<128xf32> to vector<1x128xf32>
      %26 = arith.addf %22, %25 : vector<1x128xf32>
      %c0_17 = arith.constant 0 : index
      %c0_18 = arith.constant 0 : index
      %27 = vector.load %arg9[%c0_17, %c0_18] : memref<1x128xf32, #tpu.memory_space<vmem>>, vector<1x128xf32>
      tpu.vector_store %arg9[%c0_17, %c0_18], %26 {strides = array<i32>} : memref<1x128xf32, #tpu.memory_space<vmem>>, vector<1x128xf32>,
    } else {
    }
    %c1_i32 = arith.constant 1 : i32
    %11 = arith.cmpi eq, %arg0, %c1_i32 : i32
    %12 = arith.extui %11 : i1 to i32
    %c0_i32_7 = arith.constant 0 : i32
    %13 = arith.cmpi ne, %12, %c0_i32_7 : i32
    scf.if %13 {
      %c0_9 = arith.constant 0 : index
      %c0_10 = arith.constant 0 : index
      %17 = vector.load %arg6[%c0_9, %c0_10] : memref<8x128xf32, #tpu.memory_space<vmem>>, vector<1x128xf32>
      %c1 = arith.constant 1 : index
      %c0_11 = arith.constant 0 : index
      %18 = vector.load %arg6[%c1, %c0_11] : memref<8x128xf32, #tpu.memory_space<vmem>>, vector<1x128xf32>
      %c0_12 = arith.constant 0 : index
      %c0_13 = arith.constant 0 : index
      %19 = vector.load %arg8[%c0_12, %c0_13] : memref<1x128xf32, #tpu.memory_space<vmem>>, vector<1x128xf32>
      %cst_14 = arith.constant 3.125000e-02 : f32
      %20 = vector.broadcast %cst_14 : f32 to vector<1x128xf32>
      %21 = arith.mulf %19, %20 : vector<1x128xf32>
      %c0_15 = arith.constant 0 : index
      %c0_16 = arith.constant 0 : index
      %22 = vector.load %arg9[%c0_15, %c0_16] : memref<1x128xf32, #tpu.memory_space<vmem>>, vector<1x128xf32>
      %cst_17 = arith.constant 3.125000e-02 : f32
      %23 = vector.broadcast %cst_17 : f32 to vector<1x128xf32>
      %24 = arith.mulf %22, %23 : vector<1x128xf32>
      %25 = arith.mulf %21, %21 : vector<1x128xf32>
      %26 = arith.subf %24, %25 : vector<1x128xf32>
      %cst_18 = arith.constant 9.99999974E-6 : f32
      %27 = vector.broadcast %cst_18 : f32 to vector<1x128xf32>
      %28 = arith.addf %26, %27 : vector<1x128xf32>
      %29 = math.rsqrt %28 : vector<1x128xf32>
      %30 = arith.mulf %17, %29 : vector<1x128xf32>
      %31 = arith.mulf %21, %30 : vector<1x128xf32>
      %32 = arith.subf %18, %31 : vector<1x128xf32>
      %33 = vector.broadcast %30 : vector<1x128xf32> to vector<16x128xf32>
      %34 = arith.mulf %7, %33 : vector<16x128xf32>
      %35 = vector.broadcast %32 : vector<1x128xf32> to vector<16x128xf32>
      %36 = arith.addf %34, %35 : vector<16x128xf32>
      %cst_19 = arith.constant 0.000000e+00 : f32
      %37 = vector.broadcast %cst_19 : f32 to vector<16x128xf32>
      %38 = arith.maximumf %36, %37 : vector<16x128xf32>
      %39 = arith.truncf %38 : vector<16x128xf32> to vector<16x128xbf16>
      %c0_20 = arith.constant 0 : index
      %c0_21 = arith.constant 0 : index
      %40 = vector.load %arg4[%c0_20, %c0_21] : memref<128x128xbf16, #tpu.memory_space<vmem>>, vector<128x128xbf16>
      %cst_22 = arith.constant dense<0.000000e+00> : vector<16x128xf32>
      %41 = tpu.matmul %39, %40, %cst_22 {dimension_numbers = #tpu.dot_dimension_numbers<[1], [0], [0], [1], [0, 0, 1, 1], [], []>} : vector<16x128xbf16>, vector<128x128xbf16>, vector<16x128xf32> -> vector<16x128xf32>
      %c0_23 = arith.constant 0 : index
      %c0_24 = arith.constant 0 : index
      %42 = vector.load %arg10[%c0_23, %c0_24] : memref<1x128xf32, #tpu.memory_space<vmem>>, vector<1x128xf32>
      %cst_25 = arith.constant dense<0.000000e+00> : vector<128xf32>
      %43 = vector.multi_reduction <add>, %41, %cst_25 [0] : vector<16x128xf32> to vector<128xf32>
      %44 = vector.shape_cast %43 : vector<128xf32> to vector<1x128xf32>
      %45 = arith.addf %42, %44 : vector<1x128xf32>
      %c0_26 = arith.constant 0 : index
      %c0_27 = arith.constant 0 : index
      %46 = vector.load %arg10[%c0_26, %c0_27] : memref<1x128xf32, #tpu.memory_space<vmem>>, vector<1x128xf32>
      tpu.vector_store %arg10[%c0_26, %c0_27], %45 {strides = array<i32>} : memref<1x128xf32, #tpu.memory_space<vmem>>, vector<1x128xf32>,
      %c0_28 = arith.constant 0 : index
      %c0_29 = arith.constant 0 : index
      %47 = vector.load %arg11[%c0_28, %c0_29] : memref<1x128xf32, #tpu.memory_space<vmem>>, vector<1x128xf32>
      %48 = arith.mulf %41, %41 : vector<16x128xf32>
      %cst_30 = arith.constant dense<0.000000e+00> : vector<128xf32>
      %49 = vector.multi_reduction <add>, %48, %cst_30 [0] : vector<16x128xf32> to vector<128xf32>
      %50 = vector.shape_cast %49 : vector<128xf32> to vector<1x128xf32>
      %51 = arith.addf %47, %50 : vector<1x128xf32>
      %c0_31 = arith.constant 0 : index
      %c0_32 = arith.constant 0 : index
      %52 = vector.load %arg11[%c0_31, %c0_32] : memref<1x128xf32, #tpu.memory_space<vmem>>, vector<1x128xf32>
      tpu.vector_store %arg11[%c0_31, %c0_32], %51 {strides = array<i32>} : memref<1x128xf32, #tpu.memory_space<vmem>>, vector<1x128xf32>,
    } else {
    }
    %c2_i32 = arith.constant 2 : i32
    %14 = arith.cmpi eq, %arg0, %c2_i32 : i32
    %15 = arith.extui %14 : i1 to i32
    %c0_i32_8 = arith.constant 0 : i32
    %16 = arith.cmpi ne, %15, %c0_i32_8 : i32
    scf.if %16 {
      %c0_9 = arith.constant 0 : index
      %c0_10 = arith.constant 0 : index
      %17 = vector.load %arg6[%c0_9, %c0_10] : memref<8x128xf32, #tpu.memory_space<vmem>>, vector<1x128xf32>
      %c1 = arith.constant 1 : index
      %c0_11 = arith.constant 0 : index
      %18 = vector.load %arg6[%c1, %c0_11] : memref<8x128xf32, #tpu.memory_space<vmem>>, vector<1x128xf32>
      %c0_12 = arith.constant 0 : index
      %c0_13 = arith.constant 0 : index
      %19 = vector.load %arg8[%c0_12, %c0_13] : memref<1x128xf32, #tpu.memory_space<vmem>>, vector<1x128xf32>
      %cst_14 = arith.constant 3.125000e-02 : f32
      %20 = vector.broadcast %cst_14 : f32 to vector<1x128xf32>
      %21 = arith.mulf %19, %20 : vector<1x128xf32>
      %c0_15 = arith.constant 0 : index
      %c0_16 = arith.constant 0 : index
      %22 = vector.load %arg9[%c0_15, %c0_16] : memref<1x128xf32, #tpu.memory_space<vmem>>, vector<1x128xf32>
      %cst_17 = arith.constant 3.125000e-02 : f32
      %23 = vector.broadcast %cst_17 : f32 to vector<1x128xf32>
      %24 = arith.mulf %22, %23 : vector<1x128xf32>
      %25 = arith.mulf %21, %21 : vector<1x128xf32>
      %26 = arith.subf %24, %25 : vector<1x128xf32>
      %cst_18 = arith.constant 9.99999974E-6 : f32
      %27 = vector.broadcast %cst_18 : f32 to vector<1x128xf32>
      %28 = arith.addf %26, %27 : vector<1x128xf32>
      %29 = math.rsqrt %28 : vector<1x128xf32>
      %30 = arith.mulf %17, %29 : vector<1x128xf32>
      %31 = arith.mulf %21, %30 : vector<1x128xf32>
      %32 = arith.subf %18, %31 : vector<1x128xf32>
      %33 = vector.broadcast %30 : vector<1x128xf32> to vector<16x128xf32>
      %34 = arith.mulf %7, %33 : vector<16x128xf32>
      %35 = vector.broadcast %32 : vector<1x128xf32> to vector<16x128xf32>
      %36 = arith.addf %34, %35 : vector<16x128xf32>
      %cst_19 = arith.constant 0.000000e+00 : f32
      %37 = vector.broadcast %cst_19 : f32 to vector<16x128xf32>
      %38 = arith.maximumf %36, %37 : vector<16x128xf32>
      %39 = arith.truncf %38 : vector<16x128xf32> to vector<16x128xbf16>
      %c0_20 = arith.constant 0 : index
      %c0_21 = arith.constant 0 : index
      %40 = vector.load %arg4[%c0_20, %c0_21] : memref<128x128xbf16, #tpu.memory_space<vmem>>, vector<128x128xbf16>
      %cst_22 = arith.constant dense<0.000000e+00> : vector<16x128xf32>
      %41 = tpu.matmul %39, %40, %cst_22 {dimension_numbers = #tpu.dot_dimension_numbers<[1], [0], [0], [1], [0, 0, 1, 1], [], []>} : vector<16x128xbf16>, vector<128x128xbf16>, vector<16x128xf32> -> vector<16x128xf32>
      %c2 = arith.constant 2 : index
      %c0_23 = arith.constant 0 : index
      %42 = vector.load %arg6[%c2, %c0_23] : memref<8x128xf32, #tpu.memory_space<vmem>>, vector<1x128xf32>
      %c3 = arith.constant 3 : index
      %c0_24 = arith.constant 0 : index
      %43 = vector.load %arg6[%c3, %c0_24] : memref<8x128xf32, #tpu.memory_space<vmem>>, vector<1x128xf32>
      %c0_25 = arith.constant 0 : index
      %c0_26 = arith.constant 0 : index
      %44 = vector.load %arg10[%c0_25, %c0_26] : memref<1x128xf32, #tpu.memory_space<vmem>>, vector<1x128xf32>
      %cst_27 = arith.constant 3.125000e-02 : f32
      %45 = vector.broadcast %cst_27 : f32 to vector<1x128xf32>
      %46 = arith.mulf %44, %45 : vector<1x128xf32>
      %c0_28 = arith.constant 0 : index
      %c0_29 = arith.constant 0 : index
      %47 = vector.load %arg11[%c0_28, %c0_29] : memref<1x128xf32, #tpu.memory_space<vmem>>, vector<1x128xf32>
      %cst_30 = arith.constant 3.125000e-02 : f32
      %48 = vector.broadcast %cst_30 : f32 to vector<1x128xf32>
      %49 = arith.mulf %47, %48 : vector<1x128xf32>
      %50 = arith.mulf %46, %46 : vector<1x128xf32>
      %51 = arith.subf %49, %50 : vector<1x128xf32>
      %cst_31 = arith.constant 9.99999974E-6 : f32
      %52 = vector.broadcast %cst_31 : f32 to vector<1x128xf32>
      %53 = arith.addf %51, %52 : vector<1x128xf32>
      %54 = math.rsqrt %53 : vector<1x128xf32>
      %55 = arith.mulf %42, %54 : vector<1x128xf32>
      %56 = arith.mulf %46, %55 : vector<1x128xf32>
      %57 = arith.subf %43, %56 : vector<1x128xf32>
      %58 = vector.broadcast %55 : vector<1x128xf32> to vector<16x128xf32>
      %59 = arith.mulf %41, %58 : vector<16x128xf32>
      %60 = vector.broadcast %57 : vector<1x128xf32> to vector<16x128xf32>
      %61 = arith.addf %59, %60 : vector<16x128xf32>
      %cst_32 = arith.constant 0.000000e+00 : f32
      %62 = vector.broadcast %cst_32 : f32 to vector<16x128xf32>
      %63 = arith.maximumf %61, %62 : vector<16x128xf32>
      %64 = arith.truncf %63 : vector<16x128xf32> to vector<16x128xbf16>
      %c0_33 = arith.constant 0 : index
      %c0_34 = arith.constant 0 : index
      %65 = vector.load %arg5[%c0_33, %c0_34] : memref<128x128xbf16, #tpu.memory_space<vmem>>, vector<128x128xbf16>
      %cst_35 = arith.constant dense<0.000000e+00> : vector<16x128xf32>
      %66 = tpu.matmul %64, %65, %cst_35 {dimension_numbers = #tpu.dot_dimension_numbers<[1], [0], [0], [1], [0, 0, 1, 1], [], []>} : vector<16x128xbf16>, vector<128x128xbf16>, vector<16x128xf32> -> vector<16x128xf32>
      %c4 = arith.constant 4 : index
      %c0_36 = arith.constant 0 : index
      %67 = vector.load %arg6[%c4, %c0_36] : memref<8x128xf32, #tpu.memory_space<vmem>>, vector<1x128xf32>
      %68 = vector.broadcast %67 : vector<1x128xf32> to vector<16x128xf32>
      %69 = arith.addf %66, %68 : vector<16x128xf32>
      %c0_37 = arith.constant 0 : index
      %c0_38 = arith.constant 0 : index
      %70 = vector.load %arg7[%c0_37, %c0_38] : memref<16x128xf32, #tpu.memory_space<vmem>>, vector<16x128xf32>
      tpu.vector_store %arg7[%c0_37, %c0_38], %69 {strides = array<i32>} : memref<16x128xf32, #tpu.memory_space<vmem>>, vector<16x128xf32>,
    } else {
    }
    return
  }
  func.func @transform_0(%arg0: i32, %arg1: i32) -> (i32, i32) {
    %c0_i32 = arith.constant 0 : i32
    %c0_i32_0 = arith.constant 0 : i32
    return %arg1, %c0_i32 : i32, i32
  }
  func.func @transform_1(%arg0: i32, %arg1: i32) -> (i32, i32) {
    %c0_i32 = arith.constant 0 : i32
    %c0_i32_0 = arith.constant 0 : i32
    %c0_i32_1 = arith.constant 0 : i32
    return %c0_i32, %c0_i32_0 : i32, i32
  }
  func.func @transform_2(%arg0: i32, %arg1: i32) -> (i32, i32) {
    %c0_i32 = arith.constant 0 : i32
    %c0_i32_0 = arith.constant 0 : i32
    %c0_i32_1 = arith.constant 0 : i32
    return %c0_i32, %c0_i32_0 : i32, i32
  }
  func.func @transform_3(%arg0: i32, %arg1: i32) -> (i32, i32) {
    %c0_i32 = arith.constant 0 : i32
    %c0_i32_0 = arith.constant 0 : i32
    %c0_i32_1 = arith.constant 0 : i32
    return %c0_i32, %c0_i32_0 : i32, i32
  }
  func.func @transform_4(%arg0: i32, %arg1: i32) -> (i32, i32) {
    %c0_i32 = arith.constant 0 : i32
    %c0_i32_0 = arith.constant 0 : i32
    %c0_i32_1 = arith.constant 0 : i32
    return %c0_i32, %c0_i32_0 : i32, i32
  }
  func.func @transform_5(%arg0: i32, %arg1: i32) -> (i32, i32) {
    %c0_i32 = arith.constant 0 : i32
    %c0_i32_0 = arith.constant 0 : i32
    return %arg1, %c0_i32 : i32, i32
  }
}

</mosaic_0001>

<bundles_post_ra>
// kernel: tpu_custom_call.1
= control target key start
LH: loop header
LB: loop body
LE: loop exit
PB: predicated region body
PF: predicated region fallthrough
CT: control target
= control target key end

     0   :  { %s1954_s0 = inlined_call_operand.hbm [shape: bf16[32,128], index: 0, kind: input, shape index: {}]   ;;  %s1955_s1 = inlined_call_operand.hbm [shape: bf16[128,128], index: 1, kind: input, shape index: {}]   ;;  %s1956_s2 = inlined_call_operand.hbm [shape: bf16[128,128], index: 2, kind: input, shape index: {}]   ;;  %s1957_s3 = inlined_call_operand.hbm [shape: bf16[128,128], index: 3, kind: input, shape index: {}]   ;;  %s1958_s4 = inlined_call_operand.hbm [shape: f32[8,128], index: 4, kind: input, shape index: {}]   ;;  %s1959_s5 = inlined_call_operand.hbm [shape: f32[32,128], index: 5, kind: output, shape index: {}]  }
   0x1   :  { %1962 = sst [smem:[#allocation21_spill]] %s1955_s1 }
   0x2   :  { %1963 = sst [smem:[#allocation22_spill]] %s1956_s2 }
   0x3   :  { %1964 = sst [smem:[#allocation23_spill]] %s1957_s3 }
   0x4   :  { %1965 = sst [smem:[#allocation24_spill]] %s1958_s4 }
   0x5   :  { %10 = vsyncpa [#allocation7], 0 }
   0x6   :  { %12 = vsyncpa [#allocation7 + $0x1], 0 }
   0x7   :  { %13 = vsyncpa [#allocation10], 0 }
   0x8   :  { %14 = vsyncpa [#allocation13], 0 }
   0x9   :  { %15 = vsyncpa [#allocation8], 0 }
   0xa   :  { %17 = vsyncpa [#allocation8 + $0x1], 0  ;;  %s1666_s18 = smov 0   ;;  %s1668_s19 = smov 0  }
   0xb   :  { %s1670_s20 = smov 0   ;;  %s1672_s21 = smov 0  }
   0xc   :  { %s1674_s22 = smov 0   ;;  %s1676_s23 = smov 0  }
   0xd   :  { %s1678_s24 = smov 0   ;;  %s1680_s25 = smov 0  }
   0xe LB: > { %s1034_s26 = sadd.s32 4294967295, %s1617_s25   ;;  %s1035_s27 = sadd.s32 4294967294, %s1617_s25   ;;  %s1617_s25 = sphi %s1680_s25, %s23_s25   ;;  %s1613_s24 = sphi %s1678_s24, %s1990_s24   ;;  %s1609_s23 = sphi %s1676_s23, %s1989_s23   ;;  %s1605_s22 = sphi %s1674_s22, %s1988_s22   ;;  %s1601_s21 = sphi %s1672_s21, %s1987_s21   ;;  %s1597_s20 = sphi %s1670_s20, %s1986_s20   ;;  %s1593_s19 = sphi %s1668_s19, %s1985_s19   ;;  %s1589_s18 = sphi %s1666_s18, %s1984_s18  }
   0xf   : > { %p55_p0 = scmp.ne.s32.totalorder %s1593_s19, %s1589_s18  ;;  %p1710_p1 = scmp.eq.s32.totalorder %s1034_s26, 0 }
  0x10   : > { %p1714_p2 = scmp.eq.s32.totalorder %s1034_s26, 5  ;;  %p169_p3 = scmp.eq.s32.totalorder %s1035_s27, 5 }
  0x11   : > { %p1720_p4 = por %p1710_p1, %p55_p0  ;;  %p1036_p5 = scmp.ge.s32.totalorder %s1617_s25, 1 }
  0x12   : > { %p1725_p6 = por %p169_p3, %p55_p0  ;;  %p176_p7 = scmp.lt.s32.totalorder %s1617_s25, 7 }
  0x13   : > { %s1619_s8 = smov [#allocation9]   ;;  %s1620_s11 = smov [#allocation12]  }
  0x14   : > { %s1969_s6 = scalar_select %p1725_p6, 1, 0 }
  0x15   : > { %p1730_p8 = pnand %p1036_p5, %p176_p7  ;;  %s188_s9 = sshll.u32 %s1619_s8, 4  ;;  %s189_s9 = int_to_ptr.vmem [resolvable:$true] %s188_s9 }
  0x16   : > { %s214_s12 = sshll.u32 %s1620_s11, 4  ;;  %s1621_s13 = smov [#allocation11]   ;;  %s215_s12 = int_to_ptr.vmem [resolvable:$true] %s214_s12 }
  0x17   : > { %p1232_p9 = pneg %p1730_p8  ;;  %s201_s14 = sshll.u32 %s1621_s13, 4  ;;  %s202_s14 = int_to_ptr.vmem [resolvable:$true] %s201_s14 }
  0x18   : > { %s1392_s15 = scalar_lea.vmem %s189_s9, 1024  ;;  %p1400_p3 = scmp.lt.s32.totalorder %s189_s9, %s189_s9 }
  0x19   : > { %p1738_p10 = pnand %p1232_p9, %p1710_p1  ;;  %p1393_p12 = scmp.ne.s32.totalorder %s189_s9, %s1392_s15 }
  0x1a   : > { %p1401_p5 = scmp.lt.s32.totalorder %s1392_s15, %s1392_s15 }
  0x1b   : > { %p1383_p11 = pneg %p1738_p10 }
  0x1c   : > { %p1402_p7 = por %p1401_p5, %p1400_p3 }
  0x1d   : > { %p1395_p13 = pnand %p1393_p12, %p1383_p11 }
  0x1f   : > { %p1396_p0 = pneg %p1395_p13 }
  0x21   : > { %p1403_p9 = pnand %p1402_p7, %p1396_p0 }
  0x23   : > { %1406 = shalt.err (!%p1403_p9)
}
  0x24   : > { %s1960_s16 = smov 64   ;;  %s1961_s17 = smov 4  }
  0x25   : > { %s1972_s1 = sld [smem:[#allocation21_spill]]  ;;  %s1418_s8 = scalar_lea.vmem %s215_s12, 1024 }
  0x26   : > { %p1419_p12 = scmp.ne.s32.totalorder %s215_s12, %s1418_s8  ;;  %p1426_p0 = scmp.lt.s32.totalorder %s215_s12, %s215_s12 }
  0x27   : > { %p1427_p5 = scmp.lt.s32.totalorder %s1418_s8, %s1418_s8 }
  0x28   : > { %p1421_p13 = pnand %p1419_p12, %p1383_p11 }
  0x29   : > { %p1428_p7 = por %p1427_p5, %p1426_p0 }
  0x2a   : > { %p1422_p3 = pneg %p1421_p13 }
  0x2b   : > { %1235 = dma.hbm_to_vmem [thread:$0]  (!%p1738_p10), %s1972_s1, 1024, %s189_s9, [#allocation10], %s1960_s16, %s1960_s16, %s1961_s17  }
  0x2c   : > { %p1429_p9 = pnand %p1428_p7, %p1422_p3 }
  0x2e   : > { %1432 = shalt.err (!%p1429_p9)
}
  0x2f   : > { %s1973_s3 = sld [smem:[#allocation23_spill]]  ;;  %s1444_s9 = scalar_lea.vmem %s202_s14, 1024 }
  0x30   : > { %p1445_p6 = scmp.ne.s32.totalorder %s202_s14, %s1444_s9  ;;  %p1452_p0 = scmp.lt.s32.totalorder %s202_s14, %s202_s14 }
  0x31   : > { %p1453_p3 = scmp.lt.s32.totalorder %s1444_s9, %s1444_s9 }
  0x32   : > { %p1447_p12 = pnand %p1445_p6, %p1383_p11 }
  0x33   : > { %p1454_p5 = por %p1453_p3, %p1452_p0 }
  0x34   : > { %p1448_p13 = pneg %p1447_p12 }
  0x35   : > { %1241 = dma.hbm_to_vmem [thread:$0]  (!%p1738_p10), %s1973_s3, 1024, %s215_s12, [#allocation13], %s1960_s16, %s1960_s16, %s1961_s17  }
  0x36   : > { %p1455_p7 = pnand %p1454_p5, %p1448_p13 }
  0x38   : > { %1458 = shalt.err (!%p1455_p7)
}
  0x39   : > { %s1974_s2 = sld [smem:[#allocation22_spill]]  ;;  %s1624_s12 = smov [#allocation14]  }
  0x3a   : > { %s228_s27 = sshll.u32 %s1624_s12, 4  ;;  %s229_s27 = int_to_ptr.vmem [resolvable:$true] %s228_s27 }
  0x3b   : > { %s1470_s8 = scalar_lea.vmem %s229_s27, 128  ;;  %p1478_p13 = scmp.lt.s32.totalorder %s229_s27, %s229_s27 }
  0x3c   : > { %p1471_p6 = scmp.ne.s32.totalorder %s229_s27, %s1470_s8  ;;  %p1479_p0 = scmp.lt.s32.totalorder %s1470_s8, %s1470_s8 }
  0x3e   : > { %p1473_p9 = pnand %p1471_p6, %p1383_p11  ;;  %p1480_p3 = por %p1479_p0, %p1478_p13 }
  0x3f   : > { %1238 = dma.hbm_to_vmem [thread:$0]  (!%p1738_p10), %s1974_s2, 1024, %s202_s14, [#allocation10], %s1960_s16, %s1960_s16, %s1961_s17  }
  0x40   : > { %p1474_p12 = pneg %p1473_p9 }
  0x42   : > { %p1481_p5 = pnand %p1480_p3, %p1474_p12 }
  0x44   : > { %1484 = shalt.err (!%p1481_p5)
}
  0x45   : > { %s1975_s4 = sld [smem:[#allocation24_spill]]  ;;  %s32_s14 = sadd.s32 1, %s1609_s23 }
  0x46   : > { %s35_s9 = sadd.s32 1, %s1613_s24  ;;  %p33_p11 = scmp.ge.s32.totalorder %s32_s14, 2 }
  0x47   : > { %s42_s10 = sadd.s32 1, %s1597_s20  ;;  %p49_p7 = scmp.ne.s32.totalorder %s1597_s20, %s1593_s19 }
  0x48   : > { %p50_p6 = scmp.eq.s32.totalorder %s1617_s25, 0  ;;  %s1992_s14 = smov (%p33_p11, %s32_s14), 0 }
  0x49   : > { %s1994_s9 = smov (!%p33_p11, %s35_s9), %s1613_s24  ;;  %s39_s15 = ssub.s32 %s1609_s23, %s1992_s14 }
  0x4a   : > { %p1796_p9 = por %p50_p6, %p49_p7  ;;  %p40_p12 = scmp.eq.s32.totalorder %s39_s15, 0 }
  0x4b   : > { %1244 = dma.hbm_to_vmem [thread:$0]  (!%p1738_p10), %s1975_s4, 128, %s229_s27, [#allocation13]  }
  0x4c   : > { %p37_p10 = scmp.ge.s32.totalorder %s1994_s9, 3  ;;  %p1802_p13 = por %p1714_p2, %p49_p7 }
  0x4d   : > { %p1257_p0 = scmp.lt.s32.totalorder %s1617_s25, 6  ;;  %s239_s8 = sand.u32 1, %s1597_s20  }
  0x4e   : > { %s1996_s9 = smov (%p37_p10, %s1994_s9), 0  ;;  %s1094_s11 = sshll.u32 %s1609_s23, 7 }
  0x4f   : > { %1978 = sst [smem:[#allocation20_spill]] %s1996_s9  ;;  %s1042_s13 = sshll.u32 %s239_s8, 3 }
  0x50   : > { %s1810_s27 = scalar_select %p40_p12, %s1597_s20, %s42_s10  }
  0x51   : > { %s249_s1 = scalar_lea.hbm %s1954_s0, %s1094_s11  ;;  %s243_s2 = scalar_lea.vmem [#allocation6], %s1042_s13 }
  0x52   : > { %s250_s3 = sshll.u32 %s243_s2, 4  ;;  %p1819_p3 = pnand %p1257_p0, %p1796_p9  ;;  %s251_s3 = int_to_ptr.vmem [resolvable:$true] %s250_s3 }
  0x53   : > { %s240_s15 = scalar_lea.sflag [#allocation7], %s239_s8  ;;  %s1498_s10 = scalar_lea.vmem %s251_s3, 128 }
  0x54   : > { %p1487_p2 = pneg %p1819_p3  ;;  %p1499_p5 = scmp.ne.s32.totalorder %s251_s3, %s1498_s10 }
  0x55   : > { %s1625_s4 = smov [#allocation6]  }
  0x56   : > { %p1501_p11 = pnand %p1499_p5, %p1487_p2  ;;  %s1503_s9 = sshll.u32 %s1625_s4, 4  ;;  %s1504_s9 = int_to_ptr.vmem [resolvable:$false] %s1503_s9 }
  0x57   : > { %s1505_s16 = scalar_lea.vmem %s1504_s9, 256  ;;  %p1506_p6 = scmp.lt.s32.totalorder %s251_s3, %s1504_s9 }
  0x58   : > { %p1502_p7 = pneg %p1501_p11  ;;  %p1507_p10 = scmp.lt.s32.totalorder %s1505_s16, %s1498_s10 }
  0x5a   : > { %p1508_p12 = por %p1507_p10, %p1506_p6 }
  0x5c   : > { %p1509_p9 = pnand %p1508_p12, %p1502_p7 }
  0x5e   : > { %1512 = shalt.err (!%p1509_p9)
}
  0x5f   : > { %s1980_s2 = smov 4   ;;  %s1981_s17 = smov 64  }
  0x60   : > { %1248 = dma.hbm_to_vmem [thread:$0]  (!%p1819_p3), %s249_s1, 128, %s251_s3, %s240_s15, %s1981_s17, %s1981_s17, %s1980_s2  }
  0x61   : > { %262 = sbr.rel (%p1730_p8) target bundleno = 1106 (0x452), region = 40  ;;  %s1833_s26 = sand.u32 (!%p1730_p8), 1, %s1593_s19  }
  0x62   : > { %s1046_s4 = sshll.u32 (!%p1730_p8), %s1833_s26, 3  ;;  %s265_s9 = scalar_lea.sflag (!%p1730_p8), [#allocation7], %s1833_s26 }
  0x63   : > { %s1837_s8 = scalar_lea.vmem (!%p1730_p8), [#allocation6], %s1046_s4 }
  0x66   : > { %1572 = dma.done.wait (%p1720_p4), %s265_s9, 128  }
  0x67   : > { %1574 = vsyncadd (%p1720_p4), %s265_s9, 4294967168 }
  0x68   : > { %1576 = dma.done.wait (%p1710_p1), [#allocation10], 2048  }
  0x69   : > { %1578 = vsyncadd (%p1710_p1), [#allocation10], 4294965248 }
  0x6a   : > { %1580 = dma.done.wait (%p1710_p1), [#allocation13], 1152  }
  0x6b   : > { %1582 = vsyncadd (%p1710_p1), [#allocation13], 4294966144  ;;  %s1051_s1 = sshll.u32 %s1833_s26, 4  ;;  %p314_p8 = scmp.eq.s32.totalorder %s1605_s22, 0 }
  0x6c   : > { %p315_p0 = scmp.eq.s32.totalorder %s1601_s21, 0  ;;  %s1854_s3 = scalar_lea.vmem [#allocation15], %s1051_s1 }
  0x6e   : > { %p316_p3 = pnand %p315_p0, %p314_p8 }
  0x70   : > { %319 = sbr.rel (%p316_p3) target bundleno = 120 (0x78), region = 64 }
  0x75   : > { %v1626_v0 = vmov 0.0  }
  0x76   : > { %320 = vst [vmem:[#allocation2] sm:$0x1] %v1626_v0  ;;  %321 = vst [vmem:[#allocation3] sm:$0x1] %v1626_v0 }
  0x77   : > { %322 = vst [vmem:[#allocation4] sm:$0x1] %v1626_v0  ;;  %323 = vst [vmem:[#allocation5] sm:$0x1] %v1626_v0 }
  0x78 PF: > { %v1342_v1 = vld [vmem:[#allocation9 + $0x38] sm:$0xff]   ;;  %v1627_v2 = vmov 0.0   ;;  %v1343_v3 = vld [vmem:[#allocation9 + $0x30] sm:$0xff]   ;;  %vm1628_vm0 = vmmov 0   ;;  %v1344_v4 = vld [vmem:[#allocation9 + $0x28] sm:$0xff]   ;;  %p1061_p1 = scmp.ne.s32.totalorder %s1605_s22, 0 }
  0x79   : > { %1132 = vmatprep.subr.bf16.mxu0 %v1627_v2  ;;  %1148 = vmatprep.mubr.msk.bf16.mxu0 %vm1628_vm0, %v1627_v2  ;;  %v1345_v5 = vld [vmem:[#allocation9 + $0x20] sm:$0xff]   ;;  %v1346_v6 = vld [vmem:[#allocation9 + $0x18] sm:$0xff]   ;;  %v1347_v7 = vld [vmem:[#allocation9 + $0x10] sm:$0xff]  }
  0x7a   : > { %1133 = vmatpush3.bf16.msra.mxu0 %v1342_v1  ;;  %v1348_v8 = vld [vmem:[#allocation9 + $0x8] sm:$0xff]   ;;  %v1349_v9 = vld [vmem:[#allocation9] sm:$0xff]   ;;  %v1350_v10 = vld [vmem:[%s1837_s8] sm:$0xff]  }
  0x7b   : > { %1134 = vmatprep.subr.bf16.mxu0 %v1627_v2 }
  0x7e   : > { %1135 = vmatpush3.bf16.msra.mxu0 %v1343_v3 }
  0x7f   : > { %1136 = vmatprep.subr.bf16.mxu0 %v1627_v2 }
  0x82   : > { %1137 = vmatpush3.bf16.msra.mxu0 %v1344_v4 }
  0x83   : > { %1138 = vmatprep.subr.bf16.mxu0 %v1627_v2 }
  0x86   : > { %1139 = vmatpush3.bf16.msra.mxu0 %v1345_v5 }
  0x87   : > { %1140 = vmatprep.subr.bf16.mxu0 %v1627_v2 }
  0x8a   : > { %1141 = vmatpush3.bf16.msra.mxu0 %v1346_v6 }
  0x8b   : > { %1142 = vmatprep.subr.bf16.mxu0 %v1627_v2 }
  0x8e   : > { %1143 = vmatpush3.bf16.msra.mxu0 %v1347_v7 }
  0x8f   : > { %1144 = vmatprep.subr.bf16.mxu0 %v1627_v2 }
  0x92   : > { %1145 = vmatpush3.bf16.msra.mxu0 %v1348_v8 }
  0x93   : > { %1146 = vmatprep.subr.bf16.mxu0 %v1627_v2 }
  0x96   : > { %1147 = vmatpush3.bf16.msra.mxu0 %v1349_v9 }
  0x99   : > { %1149 = vmatmul.mubr.bf16.vlgmr.msra.gmra.mxu0 %v1350_v10 }
 0x159   : > { %v1857_v11 = vpop.f32.mrf.mxu0 }
 0x15b   : > { %v1150_v12 = vpop.f32.mrf.mxu0  ;;  %439 = sbr.rel (%p1061_p1) target bundleno = 371 (0x173), region = 68 }
 0x15d   : > { %v1859_v13 = vpop.f32.mrf.mxu0 }
 0x15f   : > { %v1151_v14 = vpop.f32.mrf.mxu0 }
 0x160   : > { %v441_v15 = vadd.f32 %v1859_v13, %v1857_v11  ;;  %v451_v16 = vmul.f32 %v1857_v11, %v1857_v11  ;;  %v452_v17 = vmul.f32 %v1859_v13, %v1859_v13  ;;  %v440_v28 = vld [vmem:[#allocation2] sm:$0x1]  ;;  %v450_v31 = vld [vmem:[#allocation3] sm:$0x1] }
 0x162   : > { %v442_v18 = vrot.slane %v441_v15, 4  ;;  %v453_v19 = vadd.f32 %v452_v17, %v451_v16 }
 0x164   : > { %v443_v20 = vadd.f32 %v442_v18, %v441_v15  ;;  %v454_v21 = vrot.slane %v453_v19, 4 }
 0x166   : > { %v444_v22 = vrot.slane %v443_v20, 2  ;;  %v455_v23 = vadd.f32 %v454_v21, %v453_v19 }
 0x168   : > { %v445_v24 = vadd.f32 %v444_v22, %v443_v20  ;;  %v456_v25 = vrot.slane %v455_v23, 2 }
 0x16a   : > { %v446_v26 = vrot.slane %v445_v24, 1  ;;  %v457_v27 = vadd.f32 %v456_v25, %v455_v23 }
 0x16c   : > { %v447_v29 = vadd.f32 %v446_v26, %v445_v24  ;;  %v458_v30 = vrot.slane %v457_v27, 1 }
 0x16e   : > { %v448_v32 = vadd.f32 %v447_v29, %v440_v28  ;;  %v459_v33 = vadd.f32 %v458_v30, %v457_v27 }
 0x170   : > { %449 = vst [vmem:[#allocation2] sm:$0x1] %v448_v32  ;;  %v460_v34 = vadd.f32 %v459_v33, %v450_v31 }
 0x172   : > { %461 = vst [vmem:[#allocation3] sm:$0x1] %v460_v34 }
 0x173 PF: > { %p1062_p4 = scmp.ne.s32.totalorder %s1605_s22, 1 }
 0x175   : > { %465 = sbr.rel (%p1062_p4) target bundleno = 632 (0x278), region = 72 }
 0x17a   : > { %v1351_v35 = vld [vmem:[#allocation11 + $0x38] sm:$0xff]   ;;  %v1629_v36 = vmov 0.0   ;;  %v1352_v37 = vld [vmem:[#allocation11 + $0x30] sm:$0xff]   ;;  %vm1630_vm1 = vmmov 0   ;;  %v1353_v38 = vld [vmem:[#allocation11 + $0x28] sm:$0xff]   ;;  %v479_v49 = vlaneseq }
 0x17b   : > { %1152 = vmatprep.subr.bf16.mxu0 %v1629_v36  ;;  %1168 = vmatprep.mubr.msk.bf16.mxu0 %vm1630_vm1, %v1629_v36  ;;  %v468_v39 = vld [vmem:[#allocation2] sm:$0x1]  ;;  %v470_v41 = vld [vmem:[#allocation3] sm:$0x1]  ;;  %v1354_v42 = vld [vmem:[#allocation11 + $0x20] sm:$0xff]  }
 0x17c   : > { %1153 = vmatpush3.bf16.msra.mxu0 %v1351_v35  ;;  %v469_v40 = vmul.f32 0.03125, %v468_v39  ;;  %v471_v43 = vmul.f32 0.03125, %v470_v41  ;;  %v1355_v46 = vld [vmem:[#allocation11 + $0x18] sm:$0xff]   ;;  %v1356_v48 = vld [vmem:[#allocation11 + $0x10] sm:$0xff]   ;;  %v1357_v50 = vld [vmem:[#allocation11 + $0x8] sm:$0xff]   ;;  %v480_v51 = vshrl.u32 %v479_v49, 7 }
 0x17d   : > { %1154 = vmatprep.subr.bf16.mxu0 %v1629_v36  ;;  %v1358_v52 = vld [vmem:[#allocation11] sm:$0xff]   ;;  %v599_v24 = vld [vmem:[#allocation4] sm:$0x1]  ;;  %v609_v27 = vld [vmem:[#allocation5] sm:$0x1] }
 0x17e   : > { %v472_v44 = vmul.f32 %v469_v40, %v469_v40  ;;  %v466_v53 = vld [vmem:[#allocation14] sm:$0x1]  ;;  %v481_v54 = vsub.s32 0, %v480_v51  ;;  %v467_v57 = vld [vmem:[#allocation14 + $0x1] sm:$0x1] }
 0x180   : > { %1155 = vmatpush3.bf16.msra.mxu0 %v1352_v37  ;;  %v473_v45 = vsub.f32 %v471_v43, %v472_v44 }
 0x181   : > { %1156 = vmatprep.subr.bf16.mxu0 %v1629_v36 }
 0x182   : > { %v474_v47 = vadd.f32 1e-05, %v473_v45 }
 0x184   : > { %1157 = vmatpush3.bf16.msra.mxu0 %v1353_v38  ;;  %1359 = vrsqrt.f32 %v474_v47 }
 0x185   : > { %1158 = vmatprep.subr.bf16.mxu0 %v1629_v36 }
 0x188   : > { %1159 = vmatpush3.bf16.msra.mxu0 %v1354_v42 }
 0x189   : > { %1160 = vmatprep.subr.bf16.mxu0 %v1629_v36 }
 0x18c   : > { %1161 = vmatpush3.bf16.msra.mxu0 %v1355_v46 }
 0x18d   : > { %1162 = vmatprep.subr.bf16.mxu0 %v1629_v36 }
 0x190   : > { %1163 = vmatpush3.bf16.msra.mxu0 %v1356_v48 }
 0x191   : > { %1164 = vmatprep.subr.bf16.mxu0 %v1629_v36  ;;  %v1360_v55 = vpop.eup %1359 }
 0x192   : > { %v476_v56 = vmul.f32 %v1360_v55, %v466_v53 }
 0x194   : > { %1165 = vmatpush3.bf16.msra.mxu0 %v1357_v50  ;;  %v477_v58 = vmul.f32 %v476_v56, %v469_v40  ;;  %v482_v59 = vrot.slane %v476_v56, %v481_v54 }
 0x195   : > { %1166 = vmatprep.subr.bf16.mxu0 %v1629_v36 }
 0x196   : > { %v478_v60 = vsub.f32 %v467_v57, %v477_v58  ;;  %v483_v61 = vmul.f32 %v482_v59, %v1857_v11  ;;  %v484_v62 = vmul.f32 %v482_v59, %v1859_v13 }
 0x198   : > { %1167 = vmatpush3.bf16.msra.mxu0 %v1358_v52  ;;  %v488_v63 = vrot.slane %v478_v60, %v481_v54 }
 0x19a   : > { %v489_v0 = vadd.f32 %v488_v63, %v483_v61  ;;  %v490_v1 = vadd.f32 %v488_v63, %v484_v62 }
 0x19c   : > { %v491_v2 = vmax.f32 %v489_v0, 0.0  ;;  %v492_v3 = vmax.f32 %v490_v1, 0.0 }
 0x19e   : > { %v493_v4 = vpack.c.bf16 %v492_v3, %v491_v2 }
 0x1a0   : > { %1169 = vmatmul.mubr.bf16.vlgmr.msra.gmra.mxu0 %v493_v4 }
 0x260   : > { %v592_v5 = vpop.f32.mrf.mxu0 }
 0x261   : > { %v610_v8 = vmul.f32 %v592_v5, %v592_v5 }
 0x262   : > { %v1170_v6 = vpop.f32.mrf.mxu0 }
 0x264   : > { %v595_v7 = vpop.f32.mrf.mxu0 }
 0x265   : > { %v600_v9 = vadd.f32 %v595_v7, %v592_v5  ;;  %v611_v10 = vmul.f32 %v595_v7, %v595_v7 }
 0x266   : > { %v1171_v12 = vpop.f32.mrf.mxu0 }
 0x267   : > { %v601_v14 = vrot.slane %v600_v9, 4  ;;  %v612_v15 = vadd.f32 %v611_v10, %v610_v8 }
 0x269   : > { %v602_v16 = vadd.f32 %v601_v14, %v600_v9  ;;  %v613_v17 = vrot.slane %v612_v15, 4 }
 0x26b   : > { %v603_v18 = vrot.slane %v602_v16, 2  ;;  %v614_v19 = vadd.f32 %v613_v17, %v612_v15 }
 0x26d   : > { %v604_v20 = vadd.f32 %v603_v18, %v602_v16  ;;  %v615_v21 = vrot.slane %v614_v19, 2 }
 0x26f   : > { %v605_v22 = vrot.slane %v604_v20, 1  ;;  %v616_v23 = vadd.f32 %v615_v21, %v614_v19 }
 0x271   : > { %v606_v25 = vadd.f32 %v605_v22, %v604_v20  ;;  %v617_v26 = vrot.slane %v616_v23, 1 }
 0x273   : > { %v607_v28 = vadd.f32 %v606_v25, %v599_v24  ;;  %v618_v29 = vadd.f32 %v617_v26, %v616_v23 }
 0x275   : > { %608 = vst [vmem:[#allocation4] sm:$0x1] %v607_v28  ;;  %v619_v30 = vadd.f32 %v618_v29, %v609_v27 }
 0x277   : > { %620 = vst [vmem:[#allocation5] sm:$0x1] %v619_v30 }
 0x278 PF: > { %p1071_p2 = scmp.ne.s32.totalorder %s1605_s22, 2 }
 0x27a   : > { %624 = sbr.rel (%p1071_p2) target bundleno = 1082 (0x43a), region = 76 }
 0x27f   : > { %v1361_v31 = vld [vmem:[#allocation11 + $0x38] sm:$0xff]   ;;  %v1631_v32 = vmov 0.0   ;;  %v1362_v33 = vld [vmem:[#allocation11 + $0x30] sm:$0xff]   ;;  %vm1632_vm2 = vmmov 0   ;;  %v1363_v34 = vld [vmem:[#allocation11 + $0x28] sm:$0xff]   ;;  %v638_v49 = vlaneseq }
 0x280   : > { %1172 = vmatprep.subr.bf16.mxu0 %v1631_v32  ;;  %1192 = vmatprep.subr.bf16.mxu1 %v1631_v32  ;;  %v1364_v35 = vld [vmem:[#allocation11 + $0x20] sm:$0xff]   ;;  %v627_v36 = vld [vmem:[#allocation2] sm:$0x1]  ;;  %v629_v38 = vld [vmem:[#allocation3] sm:$0x1] }
 0x281   : > { %1173 = vmatpush3.bf16.msra.mxu0 %v1361_v31  ;;  %1188 = vmatprep.mubr.msk.bf16.mxu0 %vm1632_vm2, %v1631_v32  ;;  %v628_v37 = vmul.f32 0.03125, %v627_v36  ;;  %v1369_v39 = vld [vmem:[#allocation12 + $0x38] sm:$0xff]   ;;  %v630_v40 = vmul.f32 0.03125, %v629_v38  ;;  %v1370_v41 = vld [vmem:[#allocation12 + $0x30] sm:$0xff]   ;;  %v1371_v45 = vld [vmem:[#allocation12 + $0x28] sm:$0xff]   ;;  %v639_v52 = vshrl.u32 %v638_v49, 7 }
 0x282   : > { %1174 = vmatprep.subr.bf16.mxu0 %v1631_v32  ;;  %1208 = vmatprep.mubr.msk.bf16.mxu1 %vm1632_vm2, %v1631_v32  ;;  %v1365_v43 = vld [vmem:[#allocation11 + $0x18] sm:$0xff]   ;;  %v1366_v47 = vld [vmem:[#allocation11 + $0x10] sm:$0xff]   ;;  %v1372_v48 = vld [vmem:[#allocation12 + $0x20] sm:$0xff]  }
 0x283   : > { %v631_v42 = vmul.f32 %v628_v37, %v628_v37  ;;  %1193 = vmatpush3.bf16.msra.mxu1 %v1369_v39  ;;  %v1367_v50 = vld [vmem:[#allocation11 + $0x8] sm:$0xff]   ;;  %v1373_v51 = vld [vmem:[#allocation12 + $0x18] sm:$0xff]   ;;  %v1368_v53 = vld [vmem:[#allocation11] sm:$0xff]   ;;  %v640_v55 = vsub.s32 0, %v639_v52 }
 0x284   : > { %1194 = vmatprep.subr.bf16.mxu1 %v1631_v32  ;;  %v625_v54 = vld [vmem:[#allocation14] sm:$0x1]  ;;  %v626_v58 = vld [vmem:[#allocation14 + $0x1] sm:$0x1]  ;;  %v1374_v6 = vld [vmem:[#allocation12 + $0x10] sm:$0xff]  }
 0x285   : > { %1175 = vmatpush3.bf16.msra.mxu0 %v1362_v33  ;;  %v632_v44 = vsub.f32 %v630_v40, %v631_v42  ;;  %v1375_v7 = vld [vmem:[#allocation12 + $0x8] sm:$0xff]   ;;  %v1376_v8 = vld [vmem:[#allocation12] sm:$0xff]  }
 0x286   : > { %1176 = vmatprep.subr.bf16.mxu0 %v1631_v32  ;;  %v758_v17 = vld [vmem:[#allocation14 + $0x2] sm:$0x1]  ;;  %v759_v20 = vld [vmem:[#allocation14 + $0x3] sm:$0x1] }
 0x287   : > { %v633_v46 = vadd.f32 1e-05, %v632_v44  ;;  %1195 = vmatpush3.bf16.msra.mxu1 %v1370_v41 }
 0x288   : > { %1196 = vmatprep.subr.bf16.mxu1 %v1631_v32 }
 0x289   : > { %1177 = vmatpush3.bf16.msra.mxu0 %v1363_v34  ;;  %1377 = vrsqrt.f32 %v633_v46 }
 0x28a   : > { %1178 = vmatprep.subr.bf16.mxu0 %v1631_v32 }
 0x28b   : > { %1197 = vmatpush3.bf16.msra.mxu1 %v1371_v45 }
 0x28c   : > { %1198 = vmatprep.subr.bf16.mxu1 %v1631_v32 }
 0x28d   : > { %1179 = vmatpush3.bf16.msra.mxu0 %v1364_v35  ;;  %v1080_v35 = vld [vmem:[#allocation14 + $0x4] ss:$0 sm:$0xff] }
 0x28e   : > { %1180 = vmatprep.subr.bf16.mxu0 %v1631_v32 }
 0x28f   : > { %1199 = vmatpush3.bf16.msra.mxu1 %v1372_v48 }
 0x290   : > { %1200 = vmatprep.subr.bf16.mxu1 %v1631_v32 }
 0x291   : > { %1181 = vmatpush3.bf16.msra.mxu0 %v1365_v43 }
 0x292   : > { %1182 = vmatprep.subr.bf16.mxu0 %v1631_v32 }
 0x293   : > { %1201 = vmatpush3.bf16.msra.mxu1 %v1373_v51 }
 0x294   : > { %1202 = vmatprep.subr.bf16.mxu1 %v1631_v32 }
 0x295   : > { %1183 = vmatpush3.bf16.msra.mxu0 %v1366_v47 }
 0x296   : > { %1184 = vmatprep.subr.bf16.mxu0 %v1631_v32  ;;  %v1378_v56 = vpop.eup %1377 }
 0x297   : > { %v635_v57 = vmul.f32 %v1378_v56, %v625_v54  ;;  %1203 = vmatpush3.bf16.msra.mxu1 %v1374_v6 }
 0x298   : > { %1204 = vmatprep.subr.bf16.mxu1 %v1631_v32 }
 0x299   : > { %1185 = vmatpush3.bf16.msra.mxu0 %v1367_v50  ;;  %v636_v59 = vmul.f32 %v635_v57, %v628_v37  ;;  %v641_v60 = vrot.slane %v635_v57, %v640_v55 }
 0x29a   : > { %1186 = vmatprep.subr.bf16.mxu0 %v1631_v32 }
 0x29b   : > { %v637_v61 = vsub.f32 %v626_v58, %v636_v59  ;;  %v642_v62 = vmul.f32 %v641_v60, %v1857_v11  ;;  %v643_v63 = vmul.f32 %v641_v60, %v1859_v13  ;;  %1205 = vmatpush3.bf16.msra.mxu1 %v1375_v7  ;;  %v760_v11 = vld [vmem:[#allocation4] sm:$0x1]  ;;  %v762_v13 = vld [vmem:[#allocation5] sm:$0x1] }
 0x29c   : > { %1206 = vmatprep.subr.bf16.mxu1 %v1631_v32  ;;  %v761_v9 = vmul.f32 0.03125, %v760_v11  ;;  %v763_v10 = vmul.f32 0.03125, %v762_v13 }
 0x29d   : > { %1187 = vmatpush3.bf16.msra.mxu0 %v1368_v53  ;;  %v647_v0 = vrot.slane %v637_v61, %v640_v55 }
 0x29e   : > { %v764_v12 = vmul.f32 %v761_v9, %v761_v9 }
 0x29f   : > { %v648_v1 = vadd.f32 %v647_v0, %v642_v62  ;;  %v649_v2 = vadd.f32 %v647_v0, %v643_v63  ;;  %1207 = vmatpush3.bf16.msra.mxu1 %v1376_v8 }
 0x2a0   : > { %v765_v14 = vsub.f32 %v763_v10, %v764_v12 }
 0x2a1   : > { %v650_v3 = vmax.f32 %v648_v1, 0.0  ;;  %v651_v4 = vmax.f32 %v649_v2, 0.0 }
 0x2a2   : > { %v766_v15 = vadd.f32 1e-05, %v765_v14 }
 0x2a3   : > { %v652_v5 = vpack.c.bf16 %v651_v4, %v650_v3 }
 0x2a4   : > { %1379 = vrsqrt.f32 %v766_v15 }
 0x2a5   : > { %1189 = vmatmul.mubr.bf16.vlgmr.msra.gmra.mxu0 %v652_v5 }
 0x2b1   : > { %v1380_v16 = vpop.eup %1379 }
 0x2b2   : > { %v768_v18 = vmul.f32 %v1380_v16, %v758_v17 }
 0x2b4   : > { %v769_v19 = vmul.f32 %v768_v18, %v761_v9  ;;  %v774_v22 = vrot.slane %v768_v18, %v640_v55 }
 0x2b6   : > { %v770_v21 = vsub.f32 %v759_v20, %v769_v19 }
 0x2b8   : > { %v780_v25 = vrot.slane %v770_v21, %v640_v55 }
 0x365   : > { %v751_v23 = vpop.f32.mrf.mxu0 }
 0x366   : > { %v775_v24 = vmul.f32 %v774_v22, %v751_v23 }
 0x367   : > { %v1190_v26 = vpop.f32.mrf.mxu0 }
 0x368   : > { %v781_v28 = vadd.f32 %v780_v25, %v775_v24 }
 0x369   : > { %v754_v27 = vpop.f32.mrf.mxu0 }
 0x36a   : > { %v776_v29 = vmul.f32 %v774_v22, %v754_v27  ;;  %v783_v32 = vmax.f32 %v781_v28, 0.0 }
 0x36b   : > { %v1191_v30 = vpop.f32.mrf.mxu0 }
 0x36c   : > { %v782_v31 = vadd.f32 %v780_v25, %v776_v29 }
 0x36e   : > { %v784_v33 = vmax.f32 %v782_v31, 0.0 }
 0x370   : > { %v785_v34 = vpack.c.bf16 %v784_v33, %v783_v32 }
 0x372   : > { %1209 = vmatmul.mubr.bf16.vlgmr.msra.gmra.mxu1 %v785_v34 }
 0x432   : > { %v889_v36 = vpop.f32.mrf.mxu1 }
 0x433   : > { %v890_v37 = vadd.f32 %v1080_v35, %v889_v36 }
 0x434   : > { %v1210_v38 = vpop.f32.mrf.mxu1 }
 0x435   : > { %896 = vst [vmem:[%s1854_s3] sm:$0xff] %v890_v37 }
 0x436   : > { %v892_v39 = vpop.f32.mrf.mxu1 }
 0x437   : > { %v893_v40 = vadd.f32 %v1080_v35, %v892_v39 }
 0x438   : > { %v1211_v41 = vpop.f32.mrf.mxu1 }
 0x439   : > { %897 = vst [vmem:[%s1854_s3 + $0x8] sm:$0xff] %v893_v40 }
 0x43a PF: > { %s1095_s22 = sshll.u32 %s1601_s21, 8  ;;  %s912_s11 = sshll.u32 %s1854_s3, 4  ;;  %s1901_s11 = int_to_ptr.vmem [resolvable:$true] %s912_s11 }
 0x43b   : > { %s1898_s7 = scalar_lea.hbm %s1959_s5, %s1095_s22  ;;  %s899_s13 = scalar_lea.sflag [#allocation8], %s1833_s26 }
 0x43c   : > { %s1513_s29 = scalar_lea.vmem %s1901_s11, 256  ;;  %s1633_s15 = smov [#allocation15]  }
 0x43d   : > { %p1514_p5 = scmp.ne.s32.totalorder %s1901_s11, %s1513_s29  ;;  %s1517_s10 = sshll.u32 %s1633_s15, 4  ;;  %s1518_s10 = int_to_ptr.vmem [resolvable:$false] %s1517_s10 }
 0x43e   : > { %s1519_s21 = scalar_lea.vmem %s1518_s10, 512  ;;  %p1520_p6 = scmp.lt.s32.totalorder %s1901_s11, %s1518_s10 }
 0x43f   : > { %p1515_p11 = pnand %p1514_p5, %p1802_p13  ;;  %p1521_p10 = scmp.lt.s32.totalorder %s1519_s21, %s1513_s29 }
 0x441   : > { %p1516_p7 = pneg %p1515_p11  ;;  %p1522_p12 = por %p1521_p10, %p1520_p6 }
 0x443   : > { %p1523_p9 = pnand %p1522_p12, %p1516_p7 }
 0x445   : > { %1526 = shalt.err (!%p1523_p9)
}
 0x446   : > { %s1527_s16 = scalar_lea.hbm %s1898_s7, 256  ;;  %s1531_s4 = scalar_lea.hbm %s1959_s5, 512 }
 0x447   : > { %p1528_p8 = scmp.ne.s32.totalorder %s1898_s7, %s1527_s16  ;;  %p1532_p1 = scmp.lt.s32.totalorder %s1898_s7, %s1959_s5 }
 0x448   : > { %p1533_p4 = scmp.lt.s32.totalorder %s1531_s4, %s1527_s16 }
 0x449   : > { %p1529_p0 = pnand %p1528_p8, %p1802_p13 }
 0x44a   : > { %p1534_p2 = por %p1533_p4, %p1532_p1 }
 0x44b   : > { %p1530_p3 = pneg %p1529_p0 }
 0x44d   : > { %p1535_p5 = pnand %p1534_p2, %p1530_p3 }
 0x44f   : > { %1538 = shalt.err (!%p1535_p5)
}
 0x450   : > { %s1634_s1 = smov 128   ;;  %s1635_s3 = smov 8  }
 0x451   : > { %1230 = dma.vmem_to_hbm [thread:$0]  (%p1802_p13), %s1901_s11, 256, %s1898_s7, %s899_s13, %s1634_s1, %s1634_s1, %s1635_s3  }
 0x452 PF: > { %p1262_p11 = scmp.ge.s32.totalorder %s1617_s25, 2  ;;  %s927_s22 = sand.u32 1, %s1589_s18  }
 0x453   : > { %p1982_p7 = scmp.ne.s32.totalorder %s1969_s6, 0  ;;  %s928_s28 = scalar_lea.sflag [#allocation8], %s927_s22 }
 0x455   : > { %p1250_p6 = pnand %p1262_p11, %p1982_p7 }
 0x457   : > { %p1251_p10 = pneg %p1250_p6 }
 0x459   : > { %1584 = dma.done.wait (%p1251_p10), %s928_s28, 256  }
 0x45a   : > { %1586 = vsyncadd (%p1251_p10), %s928_s28, 4294967040  ;;  %s23_s25 = sadd.s32 1, %s1617_s25   ;;  %s1983_s12 = sld [smem:[#allocation20_spill]] }
 0x45b   : > { %p20_p12 = scmp.ge.s32.totalorder %s23_s25, 8   ;;  %s1984_s18 = smov %s1593_s19 }
 0x45c   : > { %s1985_s19 = smov %s1597_s20  ;;  %s1986_s20 = smov %s1810_s27 }
 0x45d   : > { %s1987_s21 = smov %s1609_s23  ;;  %s1988_s22 = smov %s1613_s24 }
 0x45e   : > { %s1989_s23 = smov %s1992_s14  ;;  %22 = sbr.rel (!%p20_p12) target bundleno = 14 (0xe), region = 117 }
 0x460   : > { %s1990_s24 = smov %s1983_s12 }
 0x463   :  { %933 = vsyncpa [#allocation7], 1 }
 0x464   :  { %935 = vsyncpa [#allocation7 + $0x1], 1 }
 0x465   :  { %936 = vsyncpa [#allocation10], 1 }
 0x466   :  { %937 = vsyncpa [#allocation13], 1 }
 0x467   :  { %938 = vsyncpa [#allocation8], 1 }
 0x468   :  { %940 = vsyncpa [#allocation8 + $0x1], 1 }

</bundles_post_ra>
